<compile_context>
chip_gen: v5e
topology: v5e:2x2
jax: 0.10.0
libtpu: 0.0.40
codegen_flags: <defaults>
</compile_context>

<pallas_src>
import functools

import jax
import jax.numpy as jnp
import numpy as np
from jax import lax
from jax.experimental import pallas as pl
from jax.experimental.pallas import tpu as pltpu


def _tap_masks(H, W):
    """Boolean (1, H*W) validity masks for the 9 taps of a 3x3 SAME conv.

    Tap k = kh*3 + kw reads input pixel (h+kh-1, w+kw-1); its mask is False at the
    flattened output positions whose neighbour lies outside the image (this replaces
    the zero padding of Conv2d(padding=1)).  Entry is None for always-valid taps.
    """
    HW = H * W
    pos = lax.broadcasted_iota(jnp.int32, (1, HW), 1)

    # Row validity needs no division: row 0 is pos < W, last row is pos >= HW - W.
    not_first_row = pos >= W
    not_last_row = pos < (HW - W)

    # Column index: bitwise AND for power-of-two W, exact f32 floor-div otherwise
    # (exact for H*W < 2**24, which covers realistic UNet feature maps).
    if (W & (W - 1)) == 0:
        col = jnp.bitwise_and(pos, W - 1)
        not_first_col = col > 0
        not_last_col = col < (W - 1)
    else:
        pos_f = pos.astype(jnp.float32)
        row_f = jnp.floor((pos_f + 0.5) * (1.0 / float(W)))
        col_f = pos_f - row_f * float(W)          # exact integer-valued f32
        not_first_col = col_f > 0.5               # col >= 1
        not_last_col = col_f < float(W - 1) - 0.5  # col <= W-2

    row_ok = {-1: not_first_row, 0: None, 1: not_last_row}
    col_ok = {-1: not_first_col, 0: None, 1: not_last_col}
    masks = []
    for k in range(9):
        dh, dw = k // 3 - 1, k % 3 - 1
        m, c = row_ok[dh], col_ok[dw]
        if m is None:
            m = c
        elif c is not None:
            m = jnp.logical_and(m, c)
        masks.append(m)
    return masks


def _conv3x3_relu(x, w_ref, b_ref, masks, W, mxu_dtype):
    """3x3 SAME conv + bias + ReLU on a lane-dense (Cin, H*W) activation.

    x      : (Cin, HW)  f32 value
    w_ref  : (9, Cout, Cin) per-tap weights (mxu_dtype), tap k = kh*3 + kw
    b_ref  : (Cout, 1)  f32 bias
    masks  : 9 (1, HW) bool masks (None => tap always valid)
    Returns (Cout, HW) f32.
    """
    Cin, HW = x.shape
    Cout = w_ref.shape[1]
    acc = jnp.zeros((Cout, HW), jnp.float32)
    for k in range(9):
        dh, dw = k // 3 - 1, k % 3 - 1
        shift = (-(dh * W + dw)) % HW
        # pltpu.roll follows jnp.roll semantics: tap[p] = x[p + dh*W + dw]; the
        # wrapped-around positions are exactly the ones zeroed by the edge mask.
        # Roll is XLU work (free slot here), not VPU/store work.
        tap = x if shift == 0 else pltpu.roll(x, shift=shift, axis=1)
        if masks[k] is not None:
            tap = jnp.where(masks[k], tap, jnp.zeros_like(tap))
        # One small MXU matmul per tap (K = Cin), f32 accumulation.  At small channel
        # counts the MXU is idle filler anyway; at large channel counts this avoids a
        # 9x im2col scratch entirely.
        acc = acc + jnp.dot(w_ref[k], tap.astype(mxu_dtype),
                            preferred_element_type=jnp.float32)
    return jnp.maximum(acc + b_ref[...], 0.0)


def _conv_block_kernel(H, W, x_ref, w1_ref, b1_ref, w2_ref, b2_ref, out_ref):
    """Fused ConvBlock for ONE image (grid iterates over the batch).

    x_ref   : (1, Cin,  H*W)  f32 input tile (lane-dense)
    w1_ref  : (9, Cmid, Cin)  per-tap conv1 weights (mxu dtype)
    b1_ref  : (Cmid, 1)       f32
    w2_ref  : (9, Cout, Cmid) per-tap conv2 weights (mxu dtype)
    b2_ref  : (Cout, 1)       f32
    out_ref : (1, Cout, H*W)  f32 output tile (lane-dense)
    """
    masks = _tap_masks(H, W)                       # computed once, reused by both convs
    mxu_dtype = w1_ref.dtype
    y1 = _conv3x3_relu(x_ref[0], w1_ref, b1_ref, masks, W, mxu_dtype)
    y2 = _conv3x3_relu(y1, w2_ref, b2_ref, masks, W, mxu_dtype)
    out_ref[0] = y2.astype(out_ref.dtype)          # single lane-dense store


def conv_block(x_nchw, params, mxu_dtype=jnp.float32):
    """Equivalent of ConvBlock.forward; input/output are NCHW like PyTorch.

    mxu_dtype: dtype of the matmul operands (weights + taps).  Use jnp.bfloat16 on
               v6e/v7x for ~2x MXU throughput; accumulation and all VPU work
               (masking is f32, bias add, ReLU) stay f32.
    """
    w1, b1, w2, b2 = params                      # HWIO weights: (3, 3, Cin, Cout)
    B, Cin, H, W = x_nchw.shape
    Cmid = w1.shape[-1]
    Cout = w2.shape[-1]
    HW = H * W

    # Per-tap weight layout (9, Cout, Cin) with tap k = kh*3 + kw; cast once for MXU.
    w1_taps = jnp.transpose(w1, (0, 1, 3, 2)).reshape(9, Cmid, Cin).astype(mxu_dtype)
    w2_taps = jnp.transpose(w2, (0, 1, 3, 2)).reshape(9, Cout, Cmid).astype(mxu_dtype)
    b1_col = b1.reshape(Cmid, 1).astype(jnp.float32)
    b2_col = b2.reshape(Cout, 1).astype(jnp.float32)

    # Lane-dense input: metadata-only reshape of contiguous NCHW.
    # (H*W need not be a multiple of 128 for correctness — blocks cover full dims —
    #  but lane-dense stores are fastest when it is, e.g. 16x16 = 256.)
    x_flat = x_nchw.astype(jnp.float32).reshape(B, Cin, HW)

    # Explicit scoped-VMEM budget: double-buffered in/out blocks + resident weights,
    # with generous headroom; never below the platform default, capped at v7x VMEM.
    w_item = jnp.dtype(mxu_dtype).itemsize
    block_bytes = 2 * (Cin * HW * 4 + Cout * HW * 4)
    weight_bytes = 2 * ((9 * Cmid * Cin + 9 * Cout * Cmid) * w_item
                        + (Cmid + Cout) * 4)
    vmem_limit = int(min(max(4 * (block_bytes + weight_bytes), 16 << 20), 64 << 20))

    grid_spec = pltpu.PrefetchScalarGridSpec(
        num_scalar_prefetch=0,
        grid=(B,),                                   # pipeline input/output DMAs over images
        in_specs=[
            pl.BlockSpec((1, Cin, HW), lambda b: (b, 0, 0)),
            # Constant-index weights/biases stay resident across the batch grid.
            # TODO(synk): pipeline_mode=pl.Buffered(1) here to drop their second buffer
            #             once channel counts make that VMEM worth reclaiming.
            pl.BlockSpec((9, Cmid, Cin), lambda b: (0, 0, 0)),
            pl.BlockSpec((Cmid, 1), lambda b: (0, 0)),
            pl.BlockSpec((9, Cout, Cmid), lambda b: (0, 0, 0)),
            pl.BlockSpec((Cout, 1), lambda b: (0, 0)),
        ],
        # Output laid out as (B, Cout, H*W): lane-dense stores; reshaped back to NCHW
        # outside (metadata only).
        out_specs=pl.BlockSpec((1, Cout, HW), lambda b: (b, 0, 0)),
    )

    out_flat = pl.pallas_call(
        functools.partial(_conv_block_kernel, H, W),
        out_shape=jax.ShapeDtypeStruct((B, Cout, HW), jnp.float32),
        grid_spec=grid_spec,
        compiler_params=pltpu.CompilerParams(
            # Batch axis is independent work: shards across v7x's 2 TensorCores;
            # harmless (single TC) on v5e/v6e.
            # TODO(synk): use pltpu.CORE_PARALLEL if a v7x profile shows one core idle.
            dimension_semantics=("parallel",),
            vmem_limit_bytes=vmem_limit,
        ),
    )(x_flat, w1_taps, b1_col, w2_taps, b2_col)

    return out_flat.reshape(B, Cout, H, W)


def init_params(key, in_channels, out_channels):
    k1, k2, k3, k4 = jax.random.split(key, 4)
    # Deterministic synthetic init (kaiming-like scale); HWIO weight layout.
    s1 = 1.0 / np.sqrt(in_channels * 9)
    s2 = 1.0 / np.sqrt(out_channels * 9)
    w1 = jax.random.normal(k1, (3, 3, in_channels, out_channels), jnp.float32) * s1
    b1 = jax.random.normal(k2, (out_channels,), jnp.float32) * 0.01
    w2 = jax.random.normal(k3, (3, 3, out_channels, out_channels), jnp.float32) * s2
    b2 = jax.random.normal(k4, (out_channels,), jnp.float32) * 0.01
    return w1, b1, w2, b2


def _reference(x_nchw, params):
    """Pure-JAX reference matching PyTorch Conv2d(k=3, pad=1) + ReLU twice."""
    w1, b1, w2, b2 = params

    def conv(x, w_hwio, b):
        w_oihw = jnp.transpose(w_hwio, (3, 2, 0, 1))
        y = jax.lax.conv_general_dilated(
            x, w_oihw, window_strides=(1, 1), padding="SAME",
            dimension_numbers=("NCHW", "OIHW", "NCHW"))
        return jnp.maximum(y + b.reshape(1, -1, 1, 1), 0.0)

    return conv(conv(x_nchw, w1, b1), w2, b2)


if __name__ == "__main__":
    B, Cin, Cout, H, W = 2, 4, 8, 16, 16

    key = jax.random.PRNGKey(0)
    kx, kp = jax.random.split(key)
    x = jax.random.normal(kx, (B, Cin, H, W), jnp.float32)
    params = init_params(kp, Cin, Cout)

    ref = jax.block_until_ready(_reference(x, params))

    # f32 MXU path (tight tolerance).
    out = jax.block_until_ready(conv_block(x, params, mxu_dtype=jnp.float32))
    assert out.shape == (B, Cout, H, W), out.shape
    np.testing.assert_allclose(np.asarray(out), np.asarray(ref), rtol=1e-4, atol=1e-4)

    # bf16 MXU path (recommended on v6e/v7x): reduced-precision matmul operands,
    # f32 accumulation/epilogue -> looser tolerance.
    out_bf16 = jax.block_until_ready(conv_block(x, params, mxu_dtype=jnp.bfloat16))
    np.testing.assert_allclose(np.asarray(out_bf16), np.asarray(ref), rtol=5e-2, atol=5e-2)

    print("KERNEL_OK")
</pallas_src>

<mosaic_0001>
module attributes {stable_mosaic.version = 11 : i64} {
  func.func @_conv_block_kernel(%arg0: i32, %arg1: memref<1x4x256xf32, #tpu.memory_space<vmem>>, %arg2: memref<9x8x4xf32, #tpu.memory_space<vmem>>, %arg3: memref<8x1xf32, #tpu.memory_space<vmem>>, %arg4: memref<9x8x8xf32, #tpu.memory_space<vmem>>, %arg5: memref<8x1xf32, #tpu.memory_space<vmem>>, %arg6: memref<1x8x256xf32, #tpu.memory_space<vmem>>) attributes {dimension_semantics = [#tpu.dimension_semantics<parallel>], iteration_bounds = array<i64: 2>, scalar_prefetch = 0 : i64, scratch_operands = 0 : i64, tpu.core_type = #tpu.core_type<tc>, window_params = [{transform_indices = @transform_0, window_bounds = array<i64: 1, 4, 256>}, {pipeline_mode = #tpu.pipeline_mode<synchronous>, transform_indices = @transform_1, window_bounds = array<i64: 9, 8, 4>}, {pipeline_mode = #tpu.pipeline_mode<synchronous>, transform_indices = @transform_2, window_bounds = array<i64: 8, 1>}, {pipeline_mode = #tpu.pipeline_mode<synchronous>, transform_indices = @transform_3, window_bounds = array<i64: 9, 8, 8>}, {pipeline_mode = #tpu.pipeline_mode<synchronous>, transform_indices = @transform_4, window_bounds = array<i64: 8, 1>}, {transform_indices = @transform_5, window_bounds = array<i64: 1, 8, 256>}]} {
    %0 = tpu.iota {dimensions = array<i32: 1>} : vector<1x256xi32>
    %c16_i32 = arith.constant 16 : i32
    %1 = vector.broadcast %c16_i32 : i32 to vector<1x256xi32>
    %2 = arith.cmpi sge, %0, %1 : vector<1x256xi32>
    %c240_i32 = arith.constant 240 : i32
    %3 = vector.broadcast %c240_i32 : i32 to vector<1x256xi32>
    %4 = arith.cmpi slt, %0, %3 : vector<1x256xi32>
    %c15_i32 = arith.constant 15 : i32
    %5 = vector.broadcast %c15_i32 : i32 to vector<1x256xi32>
    %6 = arith.andi %0, %5 : vector<1x256xi32>
    %c0_i32 = arith.constant 0 : i32
    %7 = vector.broadcast %c0_i32 : i32 to vector<1x256xi32>
    %8 = arith.cmpi sgt, %6, %7 : vector<1x256xi32>
    %c15_i32_0 = arith.constant 15 : i32
    %9 = vector.broadcast %c15_i32_0 : i32 to vector<1x256xi32>
    %10 = arith.cmpi slt, %6, %9 : vector<1x256xi32>
    %11 = arith.andi %2, %8 : vector<1x256xi1>
    %12 = arith.andi %2, %10 : vector<1x256xi1>
    %13 = arith.andi %4, %8 : vector<1x256xi1>
    %14 = arith.andi %4, %10 : vector<1x256xi1>
    %c0 = arith.constant 0 : index
    %c0_1 = arith.constant 0 : index
    %c0_2 = arith.constant 0 : index
    %15 = vector.load %arg1[%c0, %c0_1, %c0_2] : memref<1x4x256xf32, #tpu.memory_space<vmem>>, vector<1x4x256xf32>
    %16 = vector.shape_cast %15 : vector<1x4x256xf32> to vector<4x256xf32>
    %cst = arith.constant 0.000000e+00 : f32
    %17 = vector.broadcast %cst : f32 to vector<8x256xf32>
    %c17_i32 = arith.constant 17 : i32
    %18 = tpu.dynamic_rotate %16 by %c17_i32 dim 1 : vector<4x256xf32>, i32 -> vector<4x256xf32>
    %cst_3 = arith.constant 0.000000e+00 : f32
    %19 = vector.broadcast %cst_3 : f32 to vector<4x256xf32>
    %20 = vector.shape_cast %11 : vector<1x256xi1> to vector<1x256xi1>
    %21 = vector.broadcast %20 : vector<1x256xi1> to vector<4x256xi1>
    %22 = arith.select %21, %18, %19 : vector<4x256xi1>, vector<4x256xf32>
    %c0_4 = arith.constant 0 : index
    %c0_5 = arith.constant 0 : index
    %c0_6 = arith.constant 0 : index
    %23 = vector.load %arg2[%c0_4, %c0_5, %c0_6] : memref<9x8x4xf32, #tpu.memory_space<vmem>>, vector<1x8x4xf32>
    %24 = vector.shape_cast %23 : vector<1x8x4xf32> to vector<8x4xf32>
    %cst_7 = arith.constant dense<0.000000e+00> : vector<8x256xf32>
    %25 = tpu.matmul %24, %22, %cst_7 {dimension_numbers = #tpu.dot_dimension_numbers<[1], [0], [0], [1], [0, 0, 1, 1], [], []>} : vector<8x4xf32>, vector<4x256xf32>, vector<8x256xf32> -> vector<8x256xf32>
    %26 = arith.addf %17, %25 : vector<8x256xf32>
    %c16_i32_8 = arith.constant 16 : i32
    %27 = tpu.dynamic_rotate %16 by %c16_i32_8 dim 1 : vector<4x256xf32>, i32 -> vector<4x256xf32>
    %cst_9 = arith.constant 0.000000e+00 : f32
    %28 = vector.broadcast %cst_9 : f32 to vector<4x256xf32>
    %29 = vector.shape_cast %2 : vector<1x256xi1> to vector<1x256xi1>
    %30 = vector.broadcast %29 : vector<1x256xi1> to vector<4x256xi1>
    %31 = arith.select %30, %27, %28 : vector<4x256xi1>, vector<4x256xf32>
    %c1 = arith.constant 1 : index
    %c0_10 = arith.constant 0 : index
    %c0_11 = arith.constant 0 : index
    %32 = vector.load %arg2[%c1, %c0_10, %c0_11] : memref<9x8x4xf32, #tpu.memory_space<vmem>>, vector<1x8x4xf32>
    %33 = vector.shape_cast %32 : vector<1x8x4xf32> to vector<8x4xf32>
    %cst_12 = arith.constant dense<0.000000e+00> : vector<8x256xf32>
    %34 = tpu.matmul %33, %31, %cst_12 {dimension_numbers = #tpu.dot_dimension_numbers<[1], [0], [0], [1], [0, 0, 1, 1], [], []>} : vector<8x4xf32>, vector<4x256xf32>, vector<8x256xf32> -> vector<8x256xf32>
    %35 = arith.addf %26, %34 : vector<8x256xf32>
    %c15_i32_13 = arith.constant 15 : i32
    %36 = tpu.dynamic_rotate %16 by %c15_i32_13 dim 1 : vector<4x256xf32>, i32 -> vector<4x256xf32>
    %cst_14 = arith.constant 0.000000e+00 : f32
    %37 = vector.broadcast %cst_14 : f32 to vector<4x256xf32>
    %38 = vector.shape_cast %12 : vector<1x256xi1> to vector<1x256xi1>
    %39 = vector.broadcast %38 : vector<1x256xi1> to vector<4x256xi1>
    %40 = arith.select %39, %36, %37 : vector<4x256xi1>, vector<4x256xf32>
    %c2 = arith.constant 2 : index
    %c0_15 = arith.constant 0 : index
    %c0_16 = arith.constant 0 : index
    %41 = vector.load %arg2[%c2, %c0_15, %c0_16] : memref<9x8x4xf32, #tpu.memory_space<vmem>>, vector<1x8x4xf32>
    %42 = vector.shape_cast %41 : vector<1x8x4xf32> to vector<8x4xf32>
    %cst_17 = arith.constant dense<0.000000e+00> : vector<8x256xf32>
    %43 = tpu.matmul %42, %40, %cst_17 {dimension_numbers = #tpu.dot_dimension_numbers<[1], [0], [0], [1], [0, 0, 1, 1], [], []>} : vector<8x4xf32>, vector<4x256xf32>, vector<8x256xf32> -> vector<8x256xf32>
    %44 = arith.addf %35, %43 : vector<8x256xf32>
    %c1_i32 = arith.constant 1 : i32
    %45 = tpu.dynamic_rotate %16 by %c1_i32 dim 1 : vector<4x256xf32>, i32 -> vector<4x256xf32>
    %cst_18 = arith.constant 0.000000e+00 : f32
    %46 = vector.broadcast %cst_18 : f32 to vector<4x256xf32>
    %47 = vector.shape_cast %8 : vector<1x256xi1> to vector<1x256xi1>
    %48 = vector.broadcast %47 : vector<1x256xi1> to vector<4x256xi1>
    %49 = arith.select %48, %45, %46 : vector<4x256xi1>, vector<4x256xf32>
    %c3 = arith.constant 3 : index
    %c0_19 = arith.constant 0 : index
    %c0_20 = arith.constant 0 : index
    %50 = vector.load %arg2[%c3, %c0_19, %c0_20] : memref<9x8x4xf32, #tpu.memory_space<vmem>>, vector<1x8x4xf32>
    %51 = vector.shape_cast %50 : vector<1x8x4xf32> to vector<8x4xf32>
    %cst_21 = arith.constant dense<0.000000e+00> : vector<8x256xf32>
    %52 = tpu.matmul %51, %49, %cst_21 {dimension_numbers = #tpu.dot_dimension_numbers<[1], [0], [0], [1], [0, 0, 1, 1], [], []>} : vector<8x4xf32>, vector<4x256xf32>, vector<8x256xf32> -> vector<8x256xf32>
    %53 = arith.addf %44, %52 : vector<8x256xf32>
    %c4 = arith.constant 4 : index
    %c0_22 = arith.constant 0 : index
    %c0_23 = arith.constant 0 : index
    %54 = vector.load %arg2[%c4, %c0_22, %c0_23] : memref<9x8x4xf32, #tpu.memory_space<vmem>>, vector<1x8x4xf32>
    %55 = vector.shape_cast %54 : vector<1x8x4xf32> to vector<8x4xf32>
    %cst_24 = arith.constant dense<0.000000e+00> : vector<8x256xf32>
    %56 = tpu.matmul %55, %16, %cst_24 {dimension_numbers = #tpu.dot_dimension_numbers<[1], [0], [0], [1], [0, 0, 1, 1], [], []>} : vector<8x4xf32>, vector<4x256xf32>, vector<8x256xf32> -> vector<8x256xf32>
    %57 = arith.addf %53, %56 : vector<8x256xf32>
    %c255_i32 = arith.constant 255 : i32
    %58 = tpu.dynamic_rotate %16 by %c255_i32 dim 1 : vector<4x256xf32>, i32 -> vector<4x256xf32>
    %cst_25 = arith.constant 0.000000e+00 : f32
    %59 = vector.broadcast %cst_25 : f32 to vector<4x256xf32>
    %60 = vector.shape_cast %10 : vector<1x256xi1> to vector<1x256xi1>
    %61 = vector.broadcast %60 : vector<1x256xi1> to vector<4x256xi1>
    %62 = arith.select %61, %58, %59 : vector<4x256xi1>, vector<4x256xf32>
    %c5 = arith.constant 5 : index
    %c0_26 = arith.constant 0 : index
    %c0_27 = arith.constant 0 : index
    %63 = vector.load %arg2[%c5, %c0_26, %c0_27] : memref<9x8x4xf32, #tpu.memory_space<vmem>>, vector<1x8x4xf32>
    %64 = vector.shape_cast %63 : vector<1x8x4xf32> to vector<8x4xf32>
    %cst_28 = arith.constant dense<0.000000e+00> : vector<8x256xf32>
    %65 = tpu.matmul %64, %62, %cst_28 {dimension_numbers = #tpu.dot_dimension_numbers<[1], [0], [0], [1], [0, 0, 1, 1], [], []>} : vector<8x4xf32>, vector<4x256xf32>, vector<8x256xf32> -> vector<8x256xf32>
    %66 = arith.addf %57, %65 : vector<8x256xf32>
    %c241_i32 = arith.constant 241 : i32
    %67 = tpu.dynamic_rotate %16 by %c241_i32 dim 1 : vector<4x256xf32>, i32 -> vector<4x256xf32>
    %cst_29 = arith.constant 0.000000e+00 : f32
    %68 = vector.broadcast %cst_29 : f32 to vector<4x256xf32>
    %69 = vector.shape_cast %13 : vector<1x256xi1> to vector<1x256xi1>
    %70 = vector.broadcast %69 : vector<1x256xi1> to vector<4x256xi1>
    %71 = arith.select %70, %67, %68 : vector<4x256xi1>, vector<4x256xf32>
    %c6 = arith.constant 6 : index
    %c0_30 = arith.constant 0 : index
    %c0_31 = arith.constant 0 : index
    %72 = vector.load %arg2[%c6, %c0_30, %c0_31] : memref<9x8x4xf32, #tpu.memory_space<vmem>>, vector<1x8x4xf32>
    %73 = vector.shape_cast %72 : vector<1x8x4xf32> to vector<8x4xf32>
    %cst_32 = arith.constant dense<0.000000e+00> : vector<8x256xf32>
    %74 = tpu.matmul %73, %71, %cst_32 {dimension_numbers = #tpu.dot_dimension_numbers<[1], [0], [0], [1], [0, 0, 1, 1], [], []>} : vector<8x4xf32>, vector<4x256xf32>, vector<8x256xf32> -> vector<8x256xf32>
    %75 = arith.addf %66, %74 : vector<8x256xf32>
    %c240_i32_33 = arith.constant 240 : i32
    %76 = tpu.dynamic_rotate %16 by %c240_i32_33 dim 1 : vector<4x256xf32>, i32 -> vector<4x256xf32>
    %cst_34 = arith.constant 0.000000e+00 : f32
    %77 = vector.broadcast %cst_34 : f32 to vector<4x256xf32>
    %78 = vector.shape_cast %4 : vector<1x256xi1> to vector<1x256xi1>
    %79 = vector.broadcast %78 : vector<1x256xi1> to vector<4x256xi1>
    %80 = arith.select %79, %76, %77 : vector<4x256xi1>, vector<4x256xf32>
    %c7 = arith.constant 7 : index
    %c0_35 = arith.constant 0 : index
    %c0_36 = arith.constant 0 : index
    %81 = vector.load %arg2[%c7, %c0_35, %c0_36] : memref<9x8x4xf32, #tpu.memory_space<vmem>>, vector<1x8x4xf32>
    %82 = vector.shape_cast %81 : vector<1x8x4xf32> to vector<8x4xf32>
    %cst_37 = arith.constant dense<0.000000e+00> : vector<8x256xf32>
    %83 = tpu.matmul %82, %80, %cst_37 {dimension_numbers = #tpu.dot_dimension_numbers<[1], [0], [0], [1], [0, 0, 1, 1], [], []>} : vector<8x4xf32>, vector<4x256xf32>, vector<8x256xf32> -> vector<8x256xf32>
    %84 = arith.addf %75, %83 : vector<8x256xf32>
    %c239_i32 = arith.constant 239 : i32
    %85 = tpu.dynamic_rotate %16 by %c239_i32 dim 1 : vector<4x256xf32>, i32 -> vector<4x256xf32>
    %cst_38 = arith.constant 0.000000e+00 : f32
    %86 = vector.broadcast %cst_38 : f32 to vector<4x256xf32>
    %87 = vector.shape_cast %14 : vector<1x256xi1> to vector<1x256xi1>
    %88 = vector.broadcast %87 : vector<1x256xi1> to vector<4x256xi1>
    %89 = arith.select %88, %85, %86 : vector<4x256xi1>, vector<4x256xf32>
    %c8 = arith.constant 8 : index
    %c0_39 = arith.constant 0 : index
    %c0_40 = arith.constant 0 : index
    %90 = vector.load %arg2[%c8, %c0_39, %c0_40] : memref<9x8x4xf32, #tpu.memory_space<vmem>>, vector<1x8x4xf32>
    %91 = vector.shape_cast %90 : vector<1x8x4xf32> to vector<8x4xf32>
    %cst_41 = arith.constant dense<0.000000e+00> : vector<8x256xf32>
    %92 = tpu.matmul %91, %89, %cst_41 {dimension_numbers = #tpu.dot_dimension_numbers<[1], [0], [0], [1], [0, 0, 1, 1], [], []>} : vector<8x4xf32>, vector<4x256xf32>, vector<8x256xf32> -> vector<8x256xf32>
    %93 = arith.addf %84, %92 : vector<8x256xf32>
    %c0_42 = arith.constant 0 : index
    %c0_43 = arith.constant 0 : index
    %94 = vector.load %arg3[%c0_42, %c0_43] : memref<8x1xf32, #tpu.memory_space<vmem>>, vector<8x1xf32>
    %95 = vector.broadcast %94 : vector<8x1xf32> to vector<8x256xf32>
    %96 = arith.addf %93, %95 : vector<8x256xf32>
    %cst_44 = arith.constant 0.000000e+00 : f32
    %97 = vector.broadcast %cst_44 : f32 to vector<8x256xf32>
    %98 = arith.maximumf %96, %97 : vector<8x256xf32>
    %cst_45 = arith.constant 0.000000e+00 : f32
    %99 = vector.broadcast %cst_45 : f32 to vector<8x256xf32>
    %c17_i32_46 = arith.constant 17 : i32
    %100 = tpu.dynamic_rotate %98 by %c17_i32_46 dim 1 : vector<8x256xf32>, i32 -> vector<8x256xf32>
    %cst_47 = arith.constant 0.000000e+00 : f32
    %101 = vector.broadcast %cst_47 : f32 to vector<8x256xf32>
    %102 = vector.shape_cast %11 : vector<1x256xi1> to vector<1x256xi1>
    %103 = vector.broadcast %102 : vector<1x256xi1> to vector<8x256xi1>
    %104 = arith.select %103, %100, %101 : vector<8x256xi1>, vector<8x256xf32>
    %c0_48 = arith.constant 0 : index
    %c0_49 = arith.constant 0 : index
    %c0_50 = arith.constant 0 : index
    %105 = vector.load %arg4[%c0_48, %c0_49, %c0_50] : memref<9x8x8xf32, #tpu.memory_space<vmem>>, vector<1x8x8xf32>
    %106 = vector.shape_cast %105 : vector<1x8x8xf32> to vector<8x8xf32>
    %cst_51 = arith.constant dense<0.000000e+00> : vector<8x256xf32>
    %107 = tpu.matmul %106, %104, %cst_51 {dimension_numbers = #tpu.dot_dimension_numbers<[1], [0], [0], [1], [0, 0, 1, 1], [], []>} : vector<8x8xf32>, vector<8x256xf32>, vector<8x256xf32> -> vector<8x256xf32>
    %108 = arith.addf %99, %107 : vector<8x256xf32>
    %c16_i32_52 = arith.constant 16 : i32
    %109 = tpu.dynamic_rotate %98 by %c16_i32_52 dim 1 : vector<8x256xf32>, i32 -> vector<8x256xf32>
    %cst_53 = arith.constant 0.000000e+00 : f32
    %110 = vector.broadcast %cst_53 : f32 to vector<8x256xf32>
    %111 = vector.shape_cast %2 : vector<1x256xi1> to vector<1x256xi1>
    %112 = vector.broadcast %111 : vector<1x256xi1> to vector<8x256xi1>
    %113 = arith.select %112, %109, %110 : vector<8x256xi1>, vector<8x256xf32>
    %c1_54 = arith.constant 1 : index
    %c0_55 = arith.constant 0 : index
    %c0_56 = arith.constant 0 : index
    %114 = vector.load %arg4[%c1_54, %c0_55, %c0_56] : memref<9x8x8xf32, #tpu.memory_space<vmem>>, vector<1x8x8xf32>
    %115 = vector.shape_cast %114 : vector<1x8x8xf32> to vector<8x8xf32>
    %cst_57 = arith.constant dense<0.000000e+00> : vector<8x256xf32>
    %116 = tpu.matmul %115, %113, %cst_57 {dimension_numbers = #tpu.dot_dimension_numbers<[1], [0], [0], [1], [0, 0, 1, 1], [], []>} : vector<8x8xf32>, vector<8x256xf32>, vector<8x256xf32> -> vector<8x256xf32>
    %117 = arith.addf %108, %116 : vector<8x256xf32>
    %c15_i32_58 = arith.constant 15 : i32
    %118 = tpu.dynamic_rotate %98 by %c15_i32_58 dim 1 : vector<8x256xf32>, i32 -> vector<8x256xf32>
    %cst_59 = arith.constant 0.000000e+00 : f32
    %119 = vector.broadcast %cst_59 : f32 to vector<8x256xf32>
    %120 = vector.shape_cast %12 : vector<1x256xi1> to vector<1x256xi1>
    %121 = vector.broadcast %120 : vector<1x256xi1> to vector<8x256xi1>
    %122 = arith.select %121, %118, %119 : vector<8x256xi1>, vector<8x256xf32>
    %c2_60 = arith.constant 2 : index
    %c0_61 = arith.constant 0 : index
    %c0_62 = arith.constant 0 : index
    %123 = vector.load %arg4[%c2_60, %c0_61, %c0_62] : memref<9x8x8xf32, #tpu.memory_space<vmem>>, vector<1x8x8xf32>
    %124 = vector.shape_cast %123 : vector<1x8x8xf32> to vector<8x8xf32>
    %cst_63 = arith.constant dense<0.000000e+00> : vector<8x256xf32>
    %125 = tpu.matmul %124, %122, %cst_63 {dimension_numbers = #tpu.dot_dimension_numbers<[1], [0], [0], [1], [0, 0, 1, 1], [], []>} : vector<8x8xf32>, vector<8x256xf32>, vector<8x256xf32> -> vector<8x256xf32>
    %126 = arith.addf %117, %125 : vector<8x256xf32>
    %c1_i32_64 = arith.constant 1 : i32
    %127 = tpu.dynamic_rotate %98 by %c1_i32_64 dim 1 : vector<8x256xf32>, i32 -> vector<8x256xf32>
    %cst_65 = arith.constant 0.000000e+00 : f32
    %128 = vector.broadcast %cst_65 : f32 to vector<8x256xf32>
    %129 = vector.shape_cast %8 : vector<1x256xi1> to vector<1x256xi1>
    %130 = vector.broadcast %129 : vector<1x256xi1> to vector<8x256xi1>
    %131 = arith.select %130, %127, %128 : vector<8x256xi1>, vector<8x256xf32>
    %c3_66 = arith.constant 3 : index
    %c0_67 = arith.constant 0 : index
    %c0_68 = arith.constant 0 : index
    %132 = vector.load %arg4[%c3_66, %c0_67, %c0_68] : memref<9x8x8xf32, #tpu.memory_space<vmem>>, vector<1x8x8xf32>
    %133 = vector.shape_cast %132 : vector<1x8x8xf32> to vector<8x8xf32>
    %cst_69 = arith.constant dense<0.000000e+00> : vector<8x256xf32>
    %134 = tpu.matmul %133, %131, %cst_69 {dimension_numbers = #tpu.dot_dimension_numbers<[1], [0], [0], [1], [0, 0, 1, 1], [], []>} : vector<8x8xf32>, vector<8x256xf32>, vector<8x256xf32> -> vector<8x256xf32>
    %135 = arith.addf %126, %134 : vector<8x256xf32>
    %c4_70 = arith.constant 4 : index
    %c0_71 = arith.constant 0 : index
    %c0_72 = arith.constant 0 : index
    %136 = vector.load %arg4[%c4_70, %c0_71, %c0_72] : memref<9x8x8xf32, #tpu.memory_space<vmem>>, vector<1x8x8xf32>
    %137 = vector.shape_cast %136 : vector<1x8x8xf32> to vector<8x8xf32>
    %cst_73 = arith.constant dense<0.000000e+00> : vector<8x256xf32>
    %138 = tpu.matmul %137, %98, %cst_73 {dimension_numbers = #tpu.dot_dimension_numbers<[1], [0], [0], [1], [0, 0, 1, 1], [], []>} : vector<8x8xf32>, vector<8x256xf32>, vector<8x256xf32> -> vector<8x256xf32>
    %139 = arith.addf %135, %138 : vector<8x256xf32>
    %c255_i32_74 = arith.constant 255 : i32
    %140 = tpu.dynamic_rotate %98 by %c255_i32_74 dim 1 : vector<8x256xf32>, i32 -> vector<8x256xf32>
    %cst_75 = arith.constant 0.000000e+00 : f32
    %141 = vector.broadcast %cst_75 : f32 to vector<8x256xf32>
    %142 = vector.shape_cast %10 : vector<1x256xi1> to vector<1x256xi1>
    %143 = vector.broadcast %142 : vector<1x256xi1> to vector<8x256xi1>
    %144 = arith.select %143, %140, %141 : vector<8x256xi1>, vector<8x256xf32>
    %c5_76 = arith.constant 5 : index
    %c0_77 = arith.constant 0 : index
    %c0_78 = arith.constant 0 : index
    %145 = vector.load %arg4[%c5_76, %c0_77, %c0_78] : memref<9x8x8xf32, #tpu.memory_space<vmem>>, vector<1x8x8xf32>
    %146 = vector.shape_cast %145 : vector<1x8x8xf32> to vector<8x8xf32>
    %cst_79 = arith.constant dense<0.000000e+00> : vector<8x256xf32>
    %147 = tpu.matmul %146, %144, %cst_79 {dimension_numbers = #tpu.dot_dimension_numbers<[1], [0], [0], [1], [0, 0, 1, 1], [], []>} : vector<8x8xf32>, vector<8x256xf32>, vector<8x256xf32> -> vector<8x256xf32>
    %148 = arith.addf %139, %147 : vector<8x256xf32>
    %c241_i32_80 = arith.constant 241 : i32
    %149 = tpu.dynamic_rotate %98 by %c241_i32_80 dim 1 : vector<8x256xf32>, i32 -> vector<8x256xf32>
    %cst_81 = arith.constant 0.000000e+00 : f32
    %150 = vector.broadcast %cst_81 : f32 to vector<8x256xf32>
    %151 = vector.shape_cast %13 : vector<1x256xi1> to vector<1x256xi1>
    %152 = vector.broadcast %151 : vector<1x256xi1> to vector<8x256xi1>
    %153 = arith.select %152, %149, %150 : vector<8x256xi1>, vector<8x256xf32>
    %c6_82 = arith.constant 6 : index
    %c0_83 = arith.constant 0 : index
    %c0_84 = arith.constant 0 : index
    %154 = vector.load %arg4[%c6_82, %c0_83, %c0_84] : memref<9x8x8xf32, #tpu.memory_space<vmem>>, vector<1x8x8xf32>
    %155 = vector.shape_cast %154 : vector<1x8x8xf32> to vector<8x8xf32>
    %cst_85 = arith.constant dense<0.000000e+00> : vector<8x256xf32>
    %156 = tpu.matmul %155, %153, %cst_85 {dimension_numbers = #tpu.dot_dimension_numbers<[1], [0], [0], [1], [0, 0, 1, 1], [], []>} : vector<8x8xf32>, vector<8x256xf32>, vector<8x256xf32> -> vector<8x256xf32>
    %157 = arith.addf %148, %156 : vector<8x256xf32>
    %c240_i32_86 = arith.constant 240 : i32
    %158 = tpu.dynamic_rotate %98 by %c240_i32_86 dim 1 : vector<8x256xf32>, i32 -> vector<8x256xf32>
    %cst_87 = arith.constant 0.000000e+00 : f32
    %159 = vector.broadcast %cst_87 : f32 to vector<8x256xf32>
    %160 = vector.shape_cast %4 : vector<1x256xi1> to vector<1x256xi1>
    %161 = vector.broadcast %160 : vector<1x256xi1> to vector<8x256xi1>
    %162 = arith.select %161, %158, %159 : vector<8x256xi1>, vector<8x256xf32>
    %c7_88 = arith.constant 7 : index
    %c0_89 = arith.constant 0 : index
    %c0_90 = arith.constant 0 : index
    %163 = vector.load %arg4[%c7_88, %c0_89, %c0_90] : memref<9x8x8xf32, #tpu.memory_space<vmem>>, vector<1x8x8xf32>
    %164 = vector.shape_cast %163 : vector<1x8x8xf32> to vector<8x8xf32>
    %cst_91 = arith.constant dense<0.000000e+00> : vector<8x256xf32>
    %165 = tpu.matmul %164, %162, %cst_91 {dimension_numbers = #tpu.dot_dimension_numbers<[1], [0], [0], [1], [0, 0, 1, 1], [], []>} : vector<8x8xf32>, vector<8x256xf32>, vector<8x256xf32> -> vector<8x256xf32>
    %166 = arith.addf %157, %165 : vector<8x256xf32>
    %c239_i32_92 = arith.constant 239 : i32
    %167 = tpu.dynamic_rotate %98 by %c239_i32_92 dim 1 : vector<8x256xf32>, i32 -> vector<8x256xf32>
    %cst_93 = arith.constant 0.000000e+00 : f32
    %168 = vector.broadcast %cst_93 : f32 to vector<8x256xf32>
    %169 = vector.shape_cast %14 : vector<1x256xi1> to vector<1x256xi1>
    %170 = vector.broadcast %169 : vector<1x256xi1> to vector<8x256xi1>
    %171 = arith.select %170, %167, %168 : vector<8x256xi1>, vector<8x256xf32>
    %c8_94 = arith.constant 8 : index
    %c0_95 = arith.constant 0 : index
    %c0_96 = arith.constant 0 : index
    %172 = vector.load %arg4[%c8_94, %c0_95, %c0_96] : memref<9x8x8xf32, #tpu.memory_space<vmem>>, vector<1x8x8xf32>
    %173 = vector.shape_cast %172 : vector<1x8x8xf32> to vector<8x8xf32>
    %cst_97 = arith.constant dense<0.000000e+00> : vector<8x256xf32>
    %174 = tpu.matmul %173, %171, %cst_97 {dimension_numbers = #tpu.dot_dimension_numbers<[1], [0], [0], [1], [0, 0, 1, 1], [], []>} : vector<8x8xf32>, vector<8x256xf32>, vector<8x256xf32> -> vector<8x256xf32>
    %175 = arith.addf %166, %174 : vector<8x256xf32>
    %c0_98 = arith.constant 0 : index
    %c0_99 = arith.constant 0 : index
    %176 = vector.load %arg5[%c0_98, %c0_99] : memref<8x1xf32, #tpu.memory_space<vmem>>, vector<8x1xf32>
    %177 = vector.broadcast %176 : vector<8x1xf32> to vector<8x256xf32>
    %178 = arith.addf %175, %177 : vector<8x256xf32>
    %cst_100 = arith.constant 0.000000e+00 : f32
    %179 = vector.broadcast %cst_100 : f32 to vector<8x256xf32>
    %180 = arith.maximumf %178, %179 : vector<8x256xf32>
    %c0_101 = arith.constant 0 : index
    %c0_102 = arith.constant 0 : index
    %c0_103 = arith.constant 0 : index
    %181 = vector.load %arg6[%c0_101, %c0_102, %c0_103] : memref<1x8x256xf32, #tpu.memory_space<vmem>>, vector<1x8x256xf32>
    %182 = vector.shape_cast %181 : vector<1x8x256xf32> to vector<8x256xf32>
    %183 = vector.shape_cast %180 : vector<8x256xf32> to vector<1x8x256xf32>
    tpu.vector_store %arg6[%c0_101, %c0_102, %c0_103], %183 {strides = array<i32>} : memref<1x8x256xf32, #tpu.memory_space<vmem>>, vector<1x8x256xf32>,
    return
  }
  func.func @transform_0(%arg0: i32) -> (i32, i32, i32) {
    %c0_i32 = arith.constant 0 : i32
    %c0_i32_0 = arith.constant 0 : i32
    %c0_i32_1 = arith.constant 0 : i32
    return %arg0, %c0_i32, %c0_i32_0 : i32, i32, i32
  }
  func.func @transform_1(%arg0: i32) -> (i32, i32, i32) {
    %c0_i32 = arith.constant 0 : i32
    %c0_i32_0 = arith.constant 0 : i32
    %c0_i32_1 = arith.constant 0 : i32
    %c0_i32_2 = arith.constant 0 : i32
    return %c0_i32, %c0_i32_0, %c0_i32_1 : i32, i32, i32
  }
  func.func @transform_2(%arg0: i32) -> (i32, i32) {
    %c0_i32 = arith.constant 0 : i32
    %c0_i32_0 = arith.constant 0 : i32
    %c0_i32_1 = arith.constant 0 : i32
    return %c0_i32, %c0_i32_0 : i32, i32
  }
  func.func @transform_3(%arg0: i32) -> (i32, i32, i32) {
    %c0_i32 = arith.constant 0 : i32
    %c0_i32_0 = arith.constant 0 : i32
    %c0_i32_1 = arith.constant 0 : i32
    %c0_i32_2 = arith.constant 0 : i32
    return %c0_i32, %c0_i32_0, %c0_i32_1 : i32, i32, i32
  }
  func.func @transform_4(%arg0: i32) -> (i32, i32) {
    %c0_i32 = arith.constant 0 : i32
    %c0_i32_0 = arith.constant 0 : i32
    %c0_i32_1 = arith.constant 0 : i32
    return %c0_i32, %c0_i32_0 : i32, i32
  }
  func.func @transform_5(%arg0: i32) -> (i32, i32, i32) {
    %c0_i32 = arith.constant 0 : i32
    %c0_i32_0 = arith.constant 0 : i32
    %c0_i32_1 = arith.constant 0 : i32
    return %arg0, %c0_i32, %c0_i32_0 : i32, i32, i32
  }
}

</mosaic_0001>

<bundles_post_ra>
// kernel: tpu_custom_call.1
= control target key start
LH: loop header
LB: loop body
LE: loop exit
PB: predicated region body
PF: predicated region fallthrough
CT: control target
= control target key end

     0   :  { %10 = vsyncpa [#allocation3], 0  ;;  %s2119_s0 = inlined_call_operand.vmem [shape: f32[2,4,256], index: 0, kind: input, shape index: {}]   ;;  %s2120_s1 = inlined_call_operand.vmem [shape: f32[9,8,4], index: 1, kind: input, shape index: {}]   ;;  %s2121_s2 = inlined_call_operand.vmem [shape: f32[8,1], index: 2, kind: input, shape index: {}]   ;;  %s2122_s3 = inlined_call_operand.vmem [shape: f32[9,8,8], index: 3, kind: input, shape index: {}]   ;;  %s2123_s4 = inlined_call_operand.vmem [shape: f32[8,1], index: 4, kind: input, shape index: {}]   ;;  %s2124_s5 = inlined_call_operand.hbm [shape: f32[2,8,256], index: 5, kind: output, shape index: {}]  }
   0x1   :  { %12 = vsyncpa [#allocation3 + $0x1], 0  ;;  %s1697_s18 = smov 0   ;;  %s1699_s19 = smov 0  }
   0x2   :  { %s1701_s20 = smov 0   ;;  %s1703_s21 = smov 0  }
   0x3 LB: > { %s1718_s22 = sadd.s32 4294967295, %s1656_s21   ;;  %s1446_s23 = sadd.s32 4294967294, %s1656_s21   ;;  %s1656_s21 = sphi %s1703_s21, %s2158_s21   ;;  %s1652_s20 = sphi %s1701_s20, %s2157_s20   ;;  %s1648_s19 = sphi %s1699_s19, %s2156_s19   ;;  %s1644_s18 = sphi %s1697_s18, %s2155_s18  }
   0x4   : > { %s1722_s24 = sadd.s32 1, %s1656_s21   ;;  %s135_s25 = sadd.s32 1, %s1652_s20 }
   0x5   : > { %s132_s26 = ssub.s32 %s1656_s21, %s1722_s24  ;;  %p145_p0 = scmp.ne.s32.totalorder %s1652_s20, %s1648_s19 }
   0x6   : > { %p133_p1 = scmp.eq.s32.totalorder %s132_s26, 0  ;;  %p146_p2 = scmp.eq.s32.totalorder %s1718_s22, 1 }
   0x7   : > { %p151_p3 = scmp.ne.s32.totalorder %s1648_s19, %s1644_s18  ;;  %p152_p4 = scmp.eq.s32.totalorder %s1446_s23, 1 }
   0x8   : > { %s1733_s27 = scalar_select %p133_p1, %s1652_s20, %s135_s25  }
   0x9   : > { %p1735_p5 = por %p146_p2, %p145_p0  ;;  %p1739_p6 = por %p152_p4, %p151_p3 }
   0xa   : > { %p1449_p7 = scmp.ge.s32.totalorder %s1656_s21, 1  ;;  %p190_p8 = scmp.lt.s32.totalorder %s1656_s21, 3 }
   0xc   : > { %p191_p9 = pnand %p1449_p7, %p190_p8 }
   0xd   : > { %p218_p10 = scmp.lt.s32.totalorder (!%p191_p9), %s1718_s22, 1  ;;  %s1658_s10 = smov (!%p191_p9), 17  }
   0xe   : > { %194 = sbr.rel (%p191_p9) target bundleno = 639 (0x27f), region = 40  ;;  %s1659_s11 = smov (!%p191_p9), 16  }
   0xf   : > { %s1660_s12 = smov (!%p191_p9), 15   ;;  %s1661_s13 = smov (!%p191_p9), 1  }
  0x10   : > { %s1662_s14 = smov (!%p191_p9), 127   ;;  %s1663_s15 = smov (!%p191_p9), 113  }
  0x11   : > { %s1664_s16 = smov (!%p191_p9), 112   ;;  %s1665_s17 = smov (!%p191_p9), 111  }
  0x13   : > { %s219_s30 = scalar_select %p218_p10, %s1718_s22, 1  ;;  %v223_v19 = vlaneseq  ;;  %vm289_vm5 = vcmask 1043456   ;;  %vm285_vm6 = vcmask 31744   ;;  %v264_v32 = vld [vmem:[%s2120_s1] sm:$0xff]  ;;  %v1453_v43 = vld [vmem:[%s2120_s1 + $0x8] sm:$0xff]  ;;  %v1462_v51 = vld [vmem:[%s2120_s1 + $0x10] sm:$0xff] }
  0x14   : > { %v1467_v54 = vld [vmem:[%s2120_s1 + $0x18] sm:$0xff]  ;;  %v1472_v57 = vld [vmem:[%s2120_s1 + $0x20] sm:$0xff]  ;;  %v1666_v60 = vmov 0  }
  0x15   : > { %s1542_s6 = sshll.u32 %s219_s30, 3  ;;  %v1770_v20 = vand.u32 127, %v223_v19  ;;  %v865_v59 = vld [vmem:[%s2121_s2] sm:$0xff]  ;;  %1592 = vset.pattern.permute.xlu1 %v1666_v60  ;;  %1593 = vset.pattern.permute.xlu0 %v1666_v60 }
  0x16   : > { %s222_s9 = scalar_lea.vmem %s2119_s0, %s1542_s6 }
  0x17   : > { %v244_v0 = vld [vmem:[%s222_s9] sm:$0xff]  ;;  %v1773_v21 = vadd.s32 128, %v1770_v20  ;;  %v230_v23 = vand.u32 15, %v1770_v20  ;;  %vm226_vm0 = vcmp.ge.s32.totalorder %v1770_v20, 16  ;;  %vm2128_vm2 = vcmp.lt.s32.totalorder %v1770_v20, 17 }
  0x18   : > { %246 = vst [vmem:[#allocation1] ss:$2 sm:$0xff] %v244_v0  ;;  %vm394_vm7 = vcmp.lt.s32.totalorder %v1770_v20, 15  ;;  %vm274_vm9 = vcmp.lt.s32.totalorder %v1770_v20, 16  ;;  %vm2127_vm12 = vcmp.lt.s32.totalorder %v1770_v20, 1  ;;  %vm2125_vm13 = vcmp.lt.s32.totalorder %v1770_v20, 127 }
  0x19   : > { %v231_v25 = vand.u32 15, %v1773_v21  ;;  %vm1778_vm1 = vcmp.gt.s32.totalorder %v230_v23, 0  ;;  %vm1811_vm8 = vcmp.lt.s32.totalorder %v230_v23, 15  ;;  %vm229_vm14 = vcmp.lt.s32.totalorder %v1773_v21, 240 }
  0x1a   : > { %vm1791_vm4 = vmand %vm226_vm0, %vm1778_vm1  ;;  %vm2126_vm15 = vcmp.lt.s32.totalorder %v1770_v20, 113 }
  0x1b   : > { %vm1783_vm3 = vcmp.gt.s32.totalorder %v231_v25, 0  ;;  %vm1818_vm10 = vcmp.lt.s32.totalorder %v231_v25, 15  ;;  %vm1828_vm11 = vmand %vm226_vm0, %vm1811_vm8 }
  0x1f   : > { %v247_v1 = vld.sshfl [vmem:[#allocation1] sm:$0xff pattern:$0x75316420]  ;;  %v248_v2 = vld.sshfl [vmem:[#allocation1 + $0x8] sm:$0xff pattern:$0x75316420] }
  0x20   : > { %251 = vrot.lane.b32.xlu0 %v247_v1, %s1658_s10  ;;  %265 = vst [vmem:[#allocation1] ss:$2 sm:$0xff] %v244_v0 }
  0x27   : > { %v266_v3 = vld.sshfl [vmem:[#allocation1] sm:$0xff pattern:$0x75316420]  ;;  %v267_v4 = vld.sshfl [vmem:[#allocation1 + $0x8] sm:$0xff pattern:$0x75316420] }
  0x28   : > { %270 = vrot.lane.b32.xlu1 %v266_v3, %s1659_s11  ;;  %253 = vrot.lane.b32.xlu0 %v248_v2, %s1658_s10  ;;  %385 = vst [vmem:[#allocation1] ss:$2 sm:$0xff] %v244_v0 }
  0x2f   : > { %v386_v5 = vld.sshfl [vmem:[#allocation1] sm:$0xff pattern:$0x75316420]  ;;  %v387_v6 = vld.sshfl [vmem:[#allocation1 + $0x8] sm:$0xff pattern:$0x75316420] }
  0x30   : > { %272 = vrot.lane.b32.xlu1 %v267_v4, %s1659_s11  ;;  %456 = vst [vmem:[#allocation1] ss:$2 sm:$0xff] %v244_v0  ;;  %390 = vrot.lane.b32.xlu2 %v386_v5, %s1660_s12  ;;  %v1518_v4 = vld [vmem:[%s2122_s3 + $0x28] sm:$0xff] }
  0x37   : > { %v458_v7 = vld.sshfl [vmem:[#allocation1 + $0x8] sm:$0xff pattern:$0x75316420]  ;;  %v457_v8 = vld.sshfl [vmem:[#allocation1] sm:$0xff pattern:$0x75316420] }
  0x38   : > { %463 = vrot.lane.b32.xlu1 %v458_v7, %s1661_s13  ;;  %461 = vrot.lane.b32.xlu0 %v457_v8, %s1661_s13  ;;  %529 = vst [vmem:[#allocation1] ss:$2 sm:$0xff] %v244_v0  ;;  %v1482_v8 = vld [vmem:[%s2120_s1 + $0x30] sm:$0xff] }
  0x39   : > { %392 = vrot.lane.b32.xlu2 %v387_v6, %s1660_s12 }
  0x3f   : > { %v1758_v9 = vld.sshfl [vmem:[#allocation1] sm:$0xff pattern:$0x75316420]  ;;  %v1760_v10 = vld.sshfl [vmem:[#allocation1 + $0x8] sm:$0xff pattern:$0x75316420] }
  0x40   : > { %581 = vst [vmem:[#allocation1] ss:$2 sm:$0xff] %v244_v0 }
  0x47   : > { %v583_v11 = vld.sshfl [vmem:[#allocation1 + $0x8] sm:$0xff pattern:$0x75316420]  ;;  %v582_v12 = vld.sshfl [vmem:[#allocation1] sm:$0xff pattern:$0x75316420] }
  0x48   : > { %588 = vrot.lane.b32.xlu0 %v583_v11, %s1662_s14  ;;  %652 = vst [vmem:[#allocation1] ss:$2 sm:$0xff] %v244_v0  ;;  %586 = vrot.lane.b32.xlu2 %v582_v12, %s1662_s14 }
  0x4f   : > { %v653_v13 = vld.sshfl [vmem:[#allocation1] sm:$0xff pattern:$0x75316420]  ;;  %v654_v14 = vld.sshfl [vmem:[#allocation1 + $0x8] sm:$0xff pattern:$0x75316420] }
  0x50   : > { %657 = vrot.lane.b32.xlu1 %v653_v13, %s1663_s15  ;;  %723 = vst [vmem:[#allocation1] ss:$2 sm:$0xff] %v244_v0  ;;  %659 = vrot.lane.b32.xlu2 %v654_v14, %s1663_s15  ;;  %v1487_v13 = vld [vmem:[%s2120_s1 + $0x38] sm:$0xff] }
  0x57   : > { %v725_v15 = vld.sshfl [vmem:[#allocation1 + $0x8] sm:$0xff pattern:$0x75316420]  ;;  %v724_v16 = vld.sshfl [vmem:[#allocation1] sm:$0xff pattern:$0x75316420] }
  0x58   : > { %730 = vrot.lane.b32.xlu1 %v725_v15, %s1664_s16  ;;  %728 = vrot.lane.b32.xlu0 %v724_v16, %s1664_s16  ;;  %794 = vst [vmem:[#allocation1] ss:$2 sm:$0xff] %v244_v0  ;;  %v1477_v0 = vld [vmem:[%s2120_s1 + $0x28] sm:$0xff] }
  0x5f   : > { %v796_v17 = vld.sshfl [vmem:[#allocation1 + $0x8] sm:$0xff pattern:$0x75316420]  ;;  %v795_v18 = vld.sshfl [vmem:[#allocation1] sm:$0xff pattern:$0x75316420] }
  0x60   : > { %801 = vrot.lane.b32.xlu0 %v796_v17, %s1665_s17  ;;  %799 = vrot.lane.b32.xlu2 %v795_v18, %s1665_s17 }
  0x61   : > { %868 = vperm.xlu1 %1592, %v865_v59  }
  0x8a   : > { %v391_v24 = vpop.permute.xlu2 %390 }
  0x92   : > { %v252_v22 = vpop.permute.xlu0 %251 }
  0x93   : > { %v393_v36 = vpop.permute.xlu2 %392 }
  0x94   : > { %v395_v38 = vsel %vm394_vm7, %v391_v24, %v393_v36  ;;  %v396_v40 = vsel %vm394_vm7, %v393_v36, %v391_v24  ;;  %v1492_v24 = vld [vmem:[%s2120_s1 + $0x40] sm:$0xff] }
  0x95   : > { %v402_v46 = vsel %vm1818_vm10, %v395_v38, 0.0  ;;  %v401_v48 = vsel %vm1828_vm11, %v396_v40, 0.0 }
  0x9a   : > { %v271_v29 = vpop.permute.xlu1 %270  ;;  %v254_v30 = vpop.permute.xlu0 %253 }
  0x9b   : > { %v256_v31 = vsel %vm2128_vm2, %v252_v22, %v254_v30  ;;  %v257_v33 = vsel %vm2128_vm2, %v254_v30, %v252_v22  ;;  %vm1944_vm2 = vmand %vm229_vm14, %vm1818_vm10 }
  0x9c   : > { %v263_v34 = vsel %vm1783_vm3, %v256_v31, 0.0  ;;  %v262_v35 = vsel %vm1791_vm4, %v257_v33, 0.0 }
  0x9d   : > { %1460 = vmatpush.msk.msra.mxu3 %vm289_vm5, %v263_v34  ;;  %1458 = vmatpush.msk.msra.mxu2 %vm289_vm5, %v262_v35 }
  0x9e   : > { %1461 = vmatmul.msk.f32.vlgmr.msra.gmra.mxu3 %vm285_vm6, %v264_v32  ;;  %1459 = vmatmul.msk.f32.vlgmr.msra.gmra.mxu2 %vm285_vm6, %v264_v32 }
  0xa2   : > { %v273_v42 = vpop.permute.xlu1 %272  ;;  %v587_v58 = vpop.permute.xlu2 %586 }
  0xa3   : > { %v275_v44 = vsel %vm274_vm9, %v271_v29, %v273_v42  ;;  %v276_v45 = vsel %vm274_vm9, %v273_v42, %v271_v29 }
  0xa4   : > { %1456 = vmatpush.msk.msra.mxu1 %vm289_vm5, %v275_v44  ;;  %v281_v47 = vsel %vm226_vm0, %v276_v45, 0.0 }
  0xa5   : > { %1457 = vmatmul.msk.f32.vlgmr.msra.gmra.mxu1 %vm285_vm6, %v1453_v43  ;;  %1454 = vmatpush.msk.msra.mxu0 %vm289_vm5, %v281_v47 }
  0xa6   : > { %1455 = vmatmul.msk.f32.vlgmr.msra.gmra.mxu0 %vm285_vm6, %v1453_v43  ;;  %1465 = vmatpush.msk.msrb.mxu1 %vm289_vm5, %v402_v46 }
  0xa7   : > { %1463 = vmatpush.msk.msrb.mxu0 %vm289_vm5, %v401_v48 }
  0xa8   : > { %1475 = vmatpush.msk.msra.mxu1 %vm289_vm5, %v1760_v10 }
  0xa9   : > { %1473 = vmatpush.msk.msra.mxu0 %vm289_vm5, %v1758_v9 }
  0xaa   : > { %v464_v49 = vpop.permute.xlu1 %463  ;;  %v462_v50 = vpop.permute.xlu0 %461 }
  0xab   : > { %v466_v52 = vsel %vm2127_vm12, %v462_v50, %v464_v49  ;;  %v467_v53 = vsel %vm2127_vm12, %v464_v49, %v462_v50  ;;  %v660_v3 = vpop.permute.xlu2 %659  ;;  %vm803_vm12 = vcmp.lt.s32.totalorder %v1770_v20, 111 }
  0xac   : > { %v473_v55 = vsel %vm1783_vm3, %v466_v52, 0.0  ;;  %v472_v56 = vsel %vm1778_vm1, %v467_v53, 0.0 }
  0xad   : > { %1470 = vmatpush.msk.msrb.mxu3 %vm289_vm5, %v473_v55  ;;  %1466 = vmatmul.msk.f32.vlgmr.msrb.gmra.mxu1 %vm285_vm6, %v1462_v51 }
  0xae   : > { %1471 = vmatmul.msk.f32.vlgmr.msrb.gmra.mxu3 %vm285_vm6, %v1467_v54  ;;  %1468 = vmatpush.msk.msrb.mxu2 %vm289_vm5, %v472_v56 }
  0xaf   : > { %1464 = vmatmul.msk.f32.vlgmr.msrb.gmra.mxu0 %vm285_vm6, %v1462_v51  ;;  %1469 = vmatmul.msk.f32.vlgmr.msrb.gmra.mxu2 %vm285_vm6, %v1467_v54 }
  0xb5   : > { %1476 = vmatmul.msk.f32.vlgmr.msra.gmra.mxu1 %vm285_vm6, %v1472_v57 }
  0xb7   : > { %1474 = vmatmul.msk.f32.vlgmr.msra.gmra.mxu0 %vm285_vm6, %v1472_v57 }
  0xba   : > { %v589_v61 = vpop.permute.xlu0 %588  ;;  %v800_v17 = vpop.permute.xlu2 %799 }
  0xbb   : > { %v591_v62 = vsel %vm2125_vm13, %v587_v58, %v589_v61  ;;  %v592_v63 = vsel %vm2125_vm13, %v589_v61, %v587_v58  ;;  %vm1906_vm13 = vmand %vm229_vm14, %vm1783_vm3 }
  0xbc   : > { %v597_v1 = vsel %vm1811_vm8, %v591_v62, 0.0  ;;  %v598_v2 = vsel %vm1818_vm10, %v592_v63, 0.0 }
  0xbd   : > { %1478 = vmatpush.msk.msra.mxu2 %vm289_vm5, %v597_v1  ;;  %1480 = vmatpush.msk.msra.mxu3 %vm289_vm5, %v598_v2 }
  0xbe   : > { %1479 = vmatmul.msk.f32.vlgmr.msra.gmra.mxu2 %vm285_vm6, %v1477_v0  ;;  %1481 = vmatmul.msk.f32.vlgmr.msra.gmra.mxu3 %vm285_vm6, %v1477_v0 }
  0xc2   : > { %v658_v5 = vpop.permute.xlu1 %657 }
  0xc3   : > { %v662_v6 = vsel %vm2126_vm15, %v658_v5, %v660_v3  ;;  %v663_v7 = vsel %vm2126_vm15, %v660_v3, %v658_v5  ;;  %vm732_vm15 = vcmp.lt.s32.totalorder %v1770_v20, 112 }
  0xc4   : > { %v668_v9 = vsel %vm1778_vm1, %v662_v6, 0.0  ;;  %v669_v10 = vsel %vm1906_vm13, %v663_v7, 0.0 }
  0xc5   : > { %1483 = vmatpush.msk.msrb.mxu0 %vm289_vm5, %v668_v9  ;;  %1485 = vmatpush.msk.msrb.mxu1 %vm289_vm5, %v669_v10 }
  0xc6   : > { %1484 = vmatmul.msk.f32.vlgmr.msrb.gmra.mxu0 %vm285_vm6, %v1482_v8  ;;  %1486 = vmatmul.msk.f32.vlgmr.msrb.gmra.mxu1 %vm285_vm6, %v1482_v8 }
  0xca   : > { %v731_v11 = vpop.permute.xlu1 %730  ;;  %v729_v12 = vpop.permute.xlu0 %728 }
  0xcb   : > { %v733_v14 = vsel %vm732_vm15, %v729_v12, %v731_v11  ;;  %v734_v15 = vsel %vm732_vm15, %v731_v11, %v729_v12 }
  0xcc   : > { %v740_v16 = vsel %vm229_vm14, %v734_v15, 0.0  ;;  %1488 = vmatpush.msk.msrb.mxu2 %vm289_vm5, %v733_v14 }
  0xcd   : > { %1489 = vmatmul.msk.f32.vlgmr.msrb.gmra.mxu2 %vm285_vm6, %v1487_v13  ;;  %1490 = vmatpush.msk.msrb.mxu3 %vm289_vm5, %v740_v16 }
  0xce   : > { %1491 = vmatmul.msk.f32.vlgmr.msrb.gmra.mxu3 %vm285_vm6, %v1487_v13  ;;  %v1497_v13 = vld [vmem:[%s2122_s3 + $0x8] sm:$0xff] }
  0xd2   : > { %v802_v19 = vpop.permute.xlu0 %801 }
  0xd3   : > { %v804_v22 = vsel %vm803_vm12, %v800_v17, %v802_v19  ;;  %v805_v23 = vsel %vm803_vm12, %v802_v19, %v800_v17  ;;  %v869_v63 = vpop.permute.xlu1 %868 }
  0xd4   : > { %v810_v25 = vsel %vm1811_vm8, %v804_v22, 0.0  ;;  %v811_v29 = vsel %vm1944_vm2, %v805_v23, 0.0  ;;  %v1358_v22 = vld [vmem:[%s2123_s4] sm:$0xff] }
  0xd5   : > { %1493 = vmatpush.msk.msra.mxu0 %vm289_vm5, %v810_v25  ;;  %1495 = vmatpush.msk.msra.mxu1 %vm289_vm5, %v811_v29  ;;  %vm894_vm5 = vcmask 64512   ;;  %v883_v25 = vld [vmem:[%s2122_s3] sm:$0xff] }
  0xd6   : > { %1494 = vmatmul.msk.f32.vlgmr.msra.gmra.mxu0 %vm285_vm6, %v1492_v24  ;;  %1496 = vmatmul.msk.f32.vlgmr.msra.gmra.mxu1 %vm285_vm6, %v1492_v24 }
 0x121   : > { %v362_v32 = vpop.f32.mrf.mxu2  ;;  %v382_v33 = vpop.f32.mrf.mxu3 }
 0x122   : > { %v333_v31 = vpop.f32.mrf.mxu1 }
 0x123   : > { %v313_v30 = vpop.f32.mrf.mxu0  ;;  %v383_v38 = vadd.f32 %v382_v33, %v333_v31 }
 0x124   : > { %v363_v36 = vadd.f32 %v362_v32, %v313_v30  ;;  %v1505_v30 = vld [vmem:[%s2122_s3 + $0x10] sm:$0xff] }
 0x12a   : > { %v451_v35 = vpop.f32.mrf.mxu1 }
 0x12b   : > { %v455_v45 = vadd.f32 %v451_v35, %v383_v38  ;;  %v1510_v38 = vld [vmem:[%s2122_s3 + $0x18] sm:$0xff] }
 0x12c   : > { %v431_v34 = vpop.f32.mrf.mxu0 }
 0x12d   : > { %v454_v42 = vadd.f32 %v431_v34, %v363_v36 }
 0x131   : > { %v522_v43 = vpop.f32.mrf.mxu3 }
 0x132   : > { %v502_v40 = vpop.f32.mrf.mxu2  ;;  %v576_v46 = vpop.f32.mrf.mxu1  ;;  %v526_v48 = vadd.f32 %v522_v43, %v455_v45  ;;  %v1523_v45 = vld [vmem:[%s2122_s3 + $0x30] sm:$0xff] }
 0x133   : > { %v525_v47 = vadd.f32 %v502_v40, %v454_v42  ;;  %v1515_v40 = vld [vmem:[%s2122_s3 + $0x20] sm:$0xff] }
 0x134   : > { %v556_v44 = vpop.f32.mrf.mxu0  ;;  %v580_v52 = vadd.f32 %v576_v46, %v526_v48 }
 0x135   : > { %v579_v50 = vadd.f32 %v556_v44, %v525_v47 }
 0x141   : > { %v627_v49 = vpop.f32.mrf.mxu2  ;;  %v647_v51 = vpop.f32.mrf.mxu3 }
 0x142   : > { %v650_v53 = vadd.f32 %v627_v49, %v579_v50  ;;  %v651_v56 = vadd.f32 %v647_v51, %v580_v52  ;;  %v1528_v52 = vld [vmem:[%s2122_s3 + $0x38] sm:$0xff] }
 0x143   : > { %v698_v54 = vpop.f32.mrf.mxu0  ;;  %v718_v55 = vpop.f32.mrf.mxu1 }
 0x144   : > { %v721_v57 = vadd.f32 %v698_v54, %v650_v53  ;;  %v722_v58 = vadd.f32 %v718_v55, %v651_v56  ;;  %v1532_v53 = vld [vmem:[%s2122_s3 + $0x40] sm:$0xff] }
 0x150   : > { %v769_v59 = vpop.f32.mrf.mxu2 }
 0x151   : > { %v792_v60 = vadd.f32 %v769_v59, %v721_v57  ;;  %v789_v61 = vpop.f32.mrf.mxu3 }
 0x152   : > { %v793_v62 = vadd.f32 %v789_v61, %v722_v58 }
 0x153   : > { %v840_v0 = vpop.f32.mrf.mxu0  ;;  %v860_v1 = vpop.f32.mrf.mxu1 }
 0x154   : > { %v863_v2 = vadd.f32 %v840_v0, %v792_v60  ;;  %v864_v3 = vadd.f32 %v860_v1, %v793_v62 }
 0x156   : > { %v871_v5 = vadd.f32 %v869_v63, %v863_v2  ;;  %v872_v6 = vadd.f32 %v869_v63, %v864_v3 }
 0x158   : > { %v873_v7 = vmax.f32 %v871_v5, 0.0  ;;  %v874_v8 = vmax.f32 %v872_v6, 0.0 }
 0x15a   : > { %886 = vrot.lane.b32.xlu0 %v874_v8, %s1659_s11  ;;  %981 = vrot.lane.b32.xlu1 %v873_v7, %s1660_s12 }
 0x15b   : > { %884 = vrot.lane.b32.xlu2 %v873_v7, %s1659_s11  ;;  %s1614_s11 = scalar_lea.hbm %s2124_s5, 32 }
 0x162   : > { %875 = vrot.lane.b32.xlu0 %v873_v7, %s1658_s10  ;;  %877 = vrot.lane.b32.xlu1 %v874_v8, %s1658_s10 }
 0x163   : > { %983 = vrot.lane.b32.xlu2 %v874_v8, %s1660_s12 }
 0x16a   : > { %1038 = vrot.lane.b32.xlu0 %v874_v8, %s1661_s13  ;;  %1193 = vrot.lane.b32.xlu1 %v873_v7, %s1663_s15 }
 0x16b   : > { %1036 = vrot.lane.b32.xlu2 %v873_v7, %s1661_s13 }
 0x172   : > { %1138 = vrot.lane.b32.xlu0 %v873_v7, %s1662_s14  ;;  %1140 = vrot.lane.b32.xlu1 %v874_v8, %s1662_s14  ;;  %s215_s14 = sand.u32 1, %s1648_s19  }
 0x173   : > { %1195 = vrot.lane.b32.xlu2 %v874_v8, %s1663_s15  ;;  %s1450_s15 = sshll.u32 %s215_s14, 4 }
 0x174   : > { %s217_s8 = scalar_lea.vmem [#allocation2], %s1450_s15 }
 0x175   : > { %s1384_s9 = sshll.u32 %s217_s8, 4  ;;  %s1385_s9 = int_to_ptr.vmem [resolvable:$true] %s1384_s9 }
 0x17a   : > { %1305 = vrot.lane.b32.xlu0 %v874_v8, %s1665_s17  ;;  %1248 = vrot.lane.b32.xlu1 %v873_v7, %s1664_s16 }
 0x17b   : > { %1303 = vrot.lane.b32.xlu2 %v873_v7, %s1665_s17 }
 0x182   : > { %1361 = vperm.xlu0 %1593, %v1358_v22  }
 0x183   : > { %1250 = vrot.lane.b32.xlu2 %v874_v8, %s1664_s16  ;;  %s1543_s16 = sshll.u32 %s1718_s22, 4  ;;  %s1371_s22 = scalar_lea.sflag [#allocation3], %s215_s14 }
 0x184   : > { %s1382_s7 = scalar_lea.hbm %s2124_s5, %s1543_s16 }
 0x185   : > { %s1386_s23 = sshll.u32 %s1382_s7, 4  ;;  %s1387_s23 = int_to_ptr.hbm [resolvable:$true] %s1386_s23 }
 0x186   : > { %s1608_s25 = sshra.s32 %s1387_s23, 4  ;;  %s1609_s25 = int_to_ptr.hbm [resolvable:$true] %s1608_s25 }
 0x187   : > { %s1610_s26 = scalar_lea.hbm %s1609_s25, 16  ;;  %p1615_p0 = scmp.lt.s32.totalorder %s1609_s25, %s2124_s5 }
 0x188   : > { %p1611_p11 = scmp.ne.s32.totalorder %s1609_s25, %s1610_s26  ;;  %p1616_p1 = scmp.lt.s32.totalorder %s1614_s11, %s1610_s26 }
 0x18a   : > { %p1612_p12 = pnand %p1611_p11, %p1735_p5  ;;  %p1617_p2 = por %p1616_p1, %p1615_p0 }
 0x18c   : > { %p1613_p13 = pneg %p1612_p12 }
 0x18e   : > { %p1618_p3 = pnand %p1617_p2, %p1613_p13 }
 0x1b5   : > { %v885_v9 = vpop.permute.xlu2 %884 }
 0x1bd   : > { %v984_v10 = vpop.permute.xlu2 %983 }
 0x1c5   : > { %v1037_v14 = vpop.permute.xlu2 %1036 }
 0x1cc   : > { %v887_v11 = vpop.permute.xlu0 %886  ;;  %v982_v12 = vpop.permute.xlu1 %981 }
 0x1cd   : > { %v888_v15 = vsel %vm274_vm9, %v885_v9, %v887_v11  ;;  %v889_v16 = vsel %vm274_vm9, %v887_v11, %v885_v9  ;;  %v985_v17 = vsel %vm394_vm7, %v982_v12, %v984_v10  ;;  %v986_v19 = vsel %vm394_vm7, %v984_v10, %v982_v12  ;;  %v1196_v31 = vpop.permute.xlu2 %1195 }
 0x1ce   : > { %1498 = vmatpush.msk.msra.mxu2 %vm226_vm0, %v889_v16  ;;  %933 = vmatpush.msra.mxu3 %v888_v15  ;;  %vm2147_vm0 = vcmp.lt.s32.totalorder %v1770_v20, 17  ;;  %vm2149_vm7 = vcmp.lt.s32.totalorder %v1770_v20, 1 }
 0x1cf   : > { %1499 = vmatmul.msk.f32.vlgmr.msra.gmra.mxu2 %vm894_vm5, %v1497_v13  ;;  %1500 = vmatmul.msk.f32.vlgmr.msra.gmra.mxu3 %vm894_vm5, %v1497_v13  ;;  %vm2148_vm6 = vmmov %vm2147_vm0 }
 0x1d0   : > { %1506 = vmatpush.msk.msrb.mxu2 %vm1828_vm11, %v986_v19  ;;  %1508 = vmatpush.msk.msrb.mxu3 %vm1818_vm10, %v985_v17  ;;  %vm2150_vm9 = vmmov %vm2149_vm7 }
 0x1d2   : > { %1111 = vmatpush.msra.mxu2 %v873_v7  ;;  %1131 = vmatpush.msra.mxu3 %v874_v8 }
 0x1d4   : > { %v876_v23 = vpop.permute.xlu0 %875  ;;  %v878_v24 = vpop.permute.xlu1 %877 }
 0x1d5   : > { %v879_v41 = vsel %vm2147_vm0, %v876_v23, %v878_v24  ;;  %v880_v29 = vsel %vm2148_vm6, %v878_v24, %v876_v23  ;;  %v1304_v42 = vpop.permute.xlu2 %1303 }
 0x1d6   : > { %1501 = vmatpush.msk.msrb.mxu0 %vm1791_vm4, %v880_v29  ;;  %1503 = vmatpush.msk.msrb.mxu1 %vm1783_vm3, %v879_v41  ;;  %vm2151_vm4 = vcmp.lt.s32.totalorder %v1770_v20, 113 }
 0x1d7   : > { %1502 = vmatmul.msk.f32.vlgmr.msrb.gmra.mxu0 %vm894_vm5, %v883_v25  ;;  %1504 = vmatmul.msk.f32.vlgmr.msrb.gmra.mxu1 %vm894_vm5, %v883_v25  ;;  %vm2152_vm11 = vmmov %vm2151_vm4 }
 0x1d8   : > { %1507 = vmatmul.msk.f32.vlgmr.msrb.gmra.mxu2 %vm894_vm5, %v1505_v30  ;;  %1509 = vmatmul.msk.f32.vlgmr.msrb.gmra.mxu3 %vm894_vm5, %v1505_v30 }
 0x1dc   : > { %v1039_v32 = vpop.permute.xlu0 %1038  ;;  %v1194_v33 = vpop.permute.xlu1 %1193 }
 0x1dd   : > { %v1040_v34 = vsel %vm2149_vm7, %v1037_v14, %v1039_v32  ;;  %v1041_v28 = vsel %vm2150_vm9, %v1039_v32, %v1037_v14  ;;  %v1197_v35 = vsel %vm2151_vm4, %v1194_v33, %v1196_v31  ;;  %v1198_v36 = vsel %vm2152_vm11, %v1196_v31, %v1194_v33  ;;  %v1251_v46 = vpop.permute.xlu2 %1250 }
 0x1de   : > { %1511 = vmatpush.msk.msra.mxu0 %vm1778_vm1, %v1041_v28  ;;  %1513 = vmatpush.msk.msra.mxu1 %vm1783_vm3, %v1040_v34  ;;  %vm2153_vm3 = vcmp.lt.s32.totalorder %v1770_v20, 127 }
 0x1df   : > { %1524 = vmatpush.msk.msrb.mxu2 %vm1778_vm1, %v1197_v35  ;;  %1526 = vmatpush.msk.msrb.mxu3 %vm1906_vm13, %v1198_v36  ;;  %vm2154_vm0 = vmmov %vm2153_vm3 }
 0x1e0   : > { %1512 = vmatmul.msk.f32.vlgmr.msra.gmra.mxu0 %vm894_vm5, %v1510_v38  ;;  %1514 = vmatmul.msk.f32.vlgmr.msra.gmra.mxu1 %vm894_vm5, %v1510_v38 }
 0x1e1   : > { %1516 = vmatmul.msk.f32.vlgmr.msra.gmra.mxu2 %vm894_vm5, %v1515_v40  ;;  %1517 = vmatmul.msk.f32.vlgmr.msra.gmra.mxu3 %vm894_vm5, %v1515_v40 }
 0x1e4   : > { %v1139_v27 = vpop.permute.xlu0 %1138  ;;  %v1141_v43 = vpop.permute.xlu1 %1140 }
 0x1e5   : > { %v1142_v44 = vsel %vm2153_vm3, %v1139_v27, %v1141_v43  ;;  %v1143_v26 = vsel %vm2154_vm0, %v1141_v43, %v1139_v27 }
 0x1e6   : > { %1519 = vmatpush.msk.msrb.mxu0 %vm1811_vm8, %v1142_v44  ;;  %1521 = vmatpush.msk.msrb.mxu1 %vm1818_vm10, %v1143_v26 }
 0x1e8   : > { %1520 = vmatmul.msk.f32.vlgmr.msrb.gmra.mxu0 %vm894_vm5, %v1518_v4  ;;  %1522 = vmatmul.msk.f32.vlgmr.msrb.gmra.mxu1 %vm894_vm5, %v1518_v4 }
 0x1e9   : > { %1525 = vmatmul.msk.f32.vlgmr.msrb.gmra.mxu2 %vm894_vm5, %v1523_v45  ;;  %1527 = vmatmul.msk.f32.vlgmr.msrb.gmra.mxu3 %vm894_vm5, %v1523_v45 }
 0x1ec   : > { %v1306_v47 = vpop.permute.xlu0 %1305  ;;  %v1249_v48 = vpop.permute.xlu1 %1248 }
 0x1ed   : > { %v1307_v49 = vsel %vm803_vm12, %v1304_v42, %v1306_v47  ;;  %v1308_v39 = vsel %vm803_vm12, %v1306_v47, %v1304_v42  ;;  %v1252_v50 = vsel %vm732_vm15, %v1249_v48, %v1251_v46  ;;  %v1253_v51 = vsel %vm732_vm15, %v1251_v46, %v1249_v48 }
 0x1ee   : > { %1276 = vmatpush.msra.mxu0 %v1252_v50  ;;  %1530 = vmatpush.msk.msra.mxu1 %vm229_vm14, %v1253_v51 }
 0x1ef   : > { %1533 = vmatpush.msk.msra.mxu2 %vm1811_vm8, %v1307_v49  ;;  %1535 = vmatpush.msk.msra.mxu3 %vm1944_vm2, %v1308_v39 }
 0x1f0   : > { %1529 = vmatmul.msk.f32.vlgmr.msra.gmra.mxu0 %vm894_vm5, %v1528_v52  ;;  %1531 = vmatmul.msk.f32.vlgmr.msra.gmra.mxu1 %vm894_vm5, %v1528_v52 }
 0x1f1   : > { %1534 = vmatmul.msk.f32.vlgmr.msra.gmra.mxu2 %vm894_vm5, %v1532_v53  ;;  %1536 = vmatmul.msk.f32.vlgmr.msra.gmra.mxu3 %vm894_vm5, %v1532_v53 }
 0x1f4   : > { %v1362_v17 = vpop.permute.xlu0 %1361 }
 0x252   : > { %v915_v20 = vpop.f32.mrf.mxu2  ;;  %v935_v21 = vpop.f32.mrf.mxu3 }
 0x254   : > { %v958_v54 = vpop.f32.mrf.mxu0  ;;  %v978_v55 = vpop.f32.mrf.mxu1 }
 0x255   : > { %v959_v59 = vadd.f32 %v958_v54, %v915_v20  ;;  %v979_v18 = vadd.f32 %v978_v55, %v935_v21 }
 0x25b   : > { %v1011_v56 = vpop.f32.mrf.mxu2  ;;  %v1031_v57 = vpop.f32.mrf.mxu3 }
 0x25c   : > { %v1034_v60 = vadd.f32 %v1011_v56, %v959_v59  ;;  %v1035_v61 = vadd.f32 %v1031_v57, %v979_v18 }
 0x25d   : > { %v1066_v58 = vpop.f32.mrf.mxu0  ;;  %v1086_v37 = vpop.f32.mrf.mxu1 }
 0x25e   : > { %v1089_v2 = vadd.f32 %v1066_v58, %v1034_v60  ;;  %v1090_v3 = vadd.f32 %v1086_v37, %v1035_v61 }
 0x264   : > { %v1113_v62 = vpop.f32.mrf.mxu2  ;;  %v1133_v63 = vpop.f32.mrf.mxu3 }
 0x265   : > { %v1168_v0 = vpop.f32.mrf.mxu0  ;;  %v1188_v1 = vpop.f32.mrf.mxu1  ;;  %v1136_v5 = vadd.f32 %v1113_v62, %v1089_v2  ;;  %v1137_v6 = vadd.f32 %v1133_v63, %v1090_v3 }
 0x267   : > { %v1191_v9 = vadd.f32 %v1168_v0, %v1136_v5  ;;  %v1192_v10 = vadd.f32 %v1188_v1, %v1137_v6 }
 0x26c   : > { %v1223_v7 = vpop.f32.mrf.mxu2  ;;  %v1243_v8 = vpop.f32.mrf.mxu3 }
 0x26d   : > { %v1246_v11 = vadd.f32 %v1223_v7, %v1191_v9  ;;  %v1247_v12 = vadd.f32 %v1243_v8, %v1192_v10  ;;  %v1278_v13 = vpop.f32.mrf.mxu0  ;;  %v1298_v14 = vpop.f32.mrf.mxu1 }
 0x26f   : > { %v1301_v15 = vadd.f32 %v1278_v13, %v1246_v11  ;;  %v1302_v16 = vadd.f32 %v1298_v14, %v1247_v12 }
 0x274   : > { %v1333_v19 = vpop.f32.mrf.mxu2  ;;  %v1353_v22 = vpop.f32.mrf.mxu3 }
 0x275   : > { %v1356_v23 = vadd.f32 %v1333_v19, %v1301_v15  ;;  %v1357_v24 = vadd.f32 %v1353_v22, %v1302_v16 }
 0x277   : > { %v1364_v25 = vadd.f32 %v1362_v17, %v1356_v23  ;;  %v1365_v41 = vadd.f32 %v1362_v17, %v1357_v24 }
 0x279   : > { %v1366_v29 = vmax.f32 %v1364_v25, 0.0  ;;  %v1367_v30 = vmax.f32 %v1365_v41, 0.0 }
 0x27b   : > { %1368 = vst [vmem:[%s217_s8] sm:$0xff] %v1366_v29 }
 0x27c   : > { %1369 = vst [vmem:[%s217_s8 + $0x8] sm:$0xff] %v1367_v30 }
 0x27d   : > { %1621 = shalt.err (!%p1618_p3)
}
 0x27e   : > { %1544 = dma.vmem_to_hbm [thread:$0]  (%p1735_p5), %s1385_s9, 256, %s1387_s23, %s1371_s22  }
 0x27f PF: > { %p1550_p4 = scmp.ge.s32.totalorder %s1656_s21, 2  ;;  %s1398_s14 = sand.u32 1, %s1644_s18  }
 0x280   : > { %s1399_s15 = scalar_lea.sflag [#allocation3], %s1398_s14 }
 0x281   : > { %p1547_p7 = pnand %p1550_p4, %p1739_p6 }
 0x283   : > { %p1548_p8 = pneg %p1547_p7 }
 0x285   : > { %1639 = dma.done.wait (%p1548_p8), %s1399_s15, 256  }
 0x286   : > { %1641 = vsyncadd (%p1548_p8), %s1399_s15, 4294967040  ;;  %p15_p9 = scmp.ge.s32.totalorder %s1722_s24, 4   ;;  %s2155_s18 = smov %s1648_s19 }
 0x287   : > { %s2156_s19 = smov %s1652_s20  ;;  %s2157_s20 = smov %s1733_s27 }
 0x288   : > { %s2158_s21 = smov %s1722_s24  ;;  %17 = sbr.rel (!%p15_p9) target bundleno = 3 (0x3), region = 91 }
 0x28d   :  { %1405 = vsyncpa [#allocation3], 1 }
 0x28e   :  { %1407 = vsyncpa [#allocation3 + $0x1], 1 }

</bundles_post_ra>
